<compile_context>
chip_gen: v6e
topology: v6e:2x2x1
jax: 0.10.0
libtpu: 0.0.40
codegen_flags: <defaults>
</compile_context>

<pallas_src>
import functools

import jax
import jax.numpy as jnp
from jax import lax
from jax.experimental import pallas as pl
from jax.experimental.pallas import tpu as pltpu


_TARGET_TILE_BYTES = 2 << 20          # ~2 MiB f32 seg tile: ~85%+ of HBM roofline
_MAX_BLOCK_ROWS = 512                 # sublane rows per tile (multiple of 8)
_LANE_CANDIDATES = (1024, 896, 768, 640, 512, 384, 256, 128)


def _round_up(x, m):
    return (x + m - 1) // m * m


def _num_tensorcores():
    """2 only for megacore parts (v4 / v5p / v7x); 1 on v5e / v6e / unknown."""
    try:
        kind = jax.devices()[0].device_kind.lower()
    except Exception:
        return 1
    return 2 if ("v7" in kind or "v5p" in kind or "v4" in kind) else 1


def _chip_vmem_bytes():
    try:
        return int(pltpu.get_tpu_info().vmem_capacity_bytes)
    except Exception:
        return 64 << 20               # v7x per-TC physical VMEM (fleet minimum)


def _pick_lane(n_seg):
    """Lane width that divides n_seg exactly, so the wrapper reshape is a free
    metadata-only op (never a jnp.pad / extra HBM pass)."""
    for lane in _LANE_CANDIDATES:     # prefer lane-dense multiples of 128
        if n_seg % lane == 0:
            return lane
    for d in range(min(1024, n_seg), 0, -1):   # ragged fallback: biggest divisor
        if n_seg % d == 0:
            return d
    return 1


def _bce_elem(x, y):
    # Numerically stable elementwise BCE-with-logits in f32 (matches
    # torch.nn.functional.binary_cross_entropy_with_logits):
    #   max(x, 0) - x*y + log1p(exp(-|x|))
    x = x.astype(jnp.float32)
    y = y.astype(jnp.float32)
    return jnp.maximum(x, 0.0) - x * y + jnp.log1p(jnp.exp(-jnp.abs(x)))


def _hybrid_loss_kernel(pcls_ref, tcls_ref, pseg_ref, tseg_ref,
                        seg_out_ref, cls_out_ref, acc_ref, *,
                        block_rows, lane, steps, nblocks, acc_rows,
                        valid_rows_last, has_partial, has_excess):
    s = pl.program_id(0)              # split ("parallel"; megacore shard on 2-TC parts)
    r = pl.program_id(1)              # sequential reduction step within the split

    @pl.when(r == 0)
    def _init():
        acc_ref[...] = jnp.zeros_like(acc_ref)

    # Elementwise BCE on this seg tile (VPU + EUP); the f32 cast happens here,
    # so bf16 inputs cross HBM at native width.
    loss = _bce_elem(pseg_ref[...], tseg_ref[...])

    def _accum(contrib):
        # Fold the (block_rows, lane) tile down to the small (acc_rows, lane)
        # accumulator via sublane-aligned slice adds (pure VPU), so the
        # per-step scratch read-modify-write is tiny.
        if acc_rows != block_rows:
            parts = [contrib[i:i + acc_rows, :]
                     for i in range(0, block_rows, acc_rows)]
            contrib = functools.reduce(lambda a, b: a + b, parts)
        acc_ref[...] += contrib

    blk = s * steps + r               # global row-block index
    n_full = nblocks - 1 if has_partial else nblocks

    if not has_partial and not has_excess:
        _accum(loss)                  # common path: no mask, no gates at all
    else:
        if n_full > 0:
            @pl.when(blk < n_full)
            def _full_block():
                _accum(loss)

        if has_partial:
            @pl.when(blk == nblocks - 1)
            def _boundary_block():
                # Only the single partial block pays for the iota/mask.  The
                # OOB rows read unspecified data; the select keeps NaN/Inf out.
                rows = lax.broadcasted_iota(jnp.int32, (block_rows, lane), 0)
                _accum(jnp.where(rows < valid_rows_last, loss, 0.0))
        # Blocks with blk >= nblocks (grid overhang when splits does not divide
        # nblocks) contribute nothing; their DMA is clamped in the index_map.

    @pl.when(r == steps - 1)
    def _finalize():
        # Exactly one XLU tree-reduce per split.
        seg_out_ref[...] = jnp.full((8, 128), jnp.sum(acc_ref[...]), jnp.float32)

        @pl.when(s == 0)              # tiny cls head: computed once, split 0 only
        def _cls():
            cls_sum = jnp.sum(_bce_elem(pcls_ref[...], tcls_ref[...]))
            cls_out_ref[...] = jnp.full((8, 128), cls_sum, jnp.float32)

        @pl.when(s != 0)
        def _cls_zero():
            cls_out_ref[...] = jnp.zeros((8, 128), jnp.float32)


def hybrid_cls_seg_loss(pcls, tcls, pseg, tseg, seg_weight=0.2, *,
                        max_block_rows=_MAX_BLOCK_ROWS, num_splits=None):
    """Pallas implementation of HybridClsSegLoss.forward((pcls,pseg),(tcls,tseg))."""
    pcls = jnp.asarray(pcls)
    tcls = jnp.asarray(tcls)
    pseg = jnp.asarray(pseg)
    tseg = jnp.asarray(tseg)

    pcls2 = pcls.reshape(pcls.shape[0], -1)
    tcls2 = tcls.reshape(tcls.shape[0], -1)
    assert pcls2.shape == tcls2.shape
    assert pseg.shape == tseg.shape

    n_cls = int(pcls2.size)
    n_seg = int(pseg.size)
    assert n_cls > 0 and n_seg > 0, "empty cls/seg head (mean would be NaN)"

    # Lane-dense 2-D slab in NATIVE dtype.  lane divides n_seg exactly, so the
    # reshape is free and there is never a wrapper-side jnp.pad HBM pass.
    # TODO(synk): if the producer can emit tseg as bf16 (binary targets are
    # exact in bf16), pass it through natively to cut HBM bytes further.
    lane = _pick_lane(n_seg)
    rows_total = n_seg // lane
    lane_pad = _round_up(lane, 128)

    rows_by_bytes = _TARGET_TILE_BYTES // (lane_pad * 4)
    block_rows = min(rows_by_bytes, max_block_rows, _round_up(rows_total, 8))
    block_rows = max(8, block_rows // 8 * 8)

    nblocks = pl.cdiv(rows_total, block_rows)
    splits = _num_tensorcores() if num_splits is None else int(num_splits)
    splits = max(1, min(splits, nblocks))
    steps = pl.cdiv(nblocks, splits)
    total_blocks = splits * steps

    pseg2 = pseg.reshape(rows_total, lane)   # free (contiguous) reshape, no pad
    tseg2 = tseg.reshape(rows_total, lane)

    valid_rows_last = rows_total - (nblocks - 1) * block_rows
    has_partial = valid_rows_last < block_rows
    has_excess = total_blocks > nblocks
    # Small accumulator on the lane-aligned path; ragged lane widths keep the
    # conservative full-tile accumulator.
    acc_rows = 8 if lane % 128 == 0 else block_rows

    kernel = functools.partial(
        _hybrid_loss_kernel,
        block_rows=block_rows, lane=lane, steps=steps, nblocks=nblocks,
        acc_rows=acc_rows, valid_rows_last=valid_rows_last,
        has_partial=has_partial, has_excess=has_excess)

    def seg_index(sp, rp):
        # Clamp so grid-overhang blocks re-read the last real block (their
        # compute is gated off in the kernel) instead of DMA'ing out of bounds.
        return (jnp.minimum(sp * steps + rp, nblocks - 1), 0)

    seg_spec = pl.BlockSpec((block_rows, lane), seg_index)
    in_specs = [
        pl.BlockSpec(tuple(pcls2.shape), lambda sp, rp: (0, 0)),  # resident, DMA'd once
        pl.BlockSpec(tuple(tcls2.shape), lambda sp, rp: (0, 0)),
        seg_spec,
        seg_spec,
    ]
    out_specs = [
        pl.BlockSpec((8, 128), lambda sp, rp: (sp, 0)),   # per-split seg partial sum
        pl.BlockSpec((8, 128), lambda sp, rp: (sp, 0)),   # cls sum (split 0 only)
    ]
    out_shape = (
        jax.ShapeDtypeStruct((splits * 8, 128), jnp.float32),
        jax.ShapeDtypeStruct((splits * 8, 128), jnp.float32),
    )

    # VMEM budget: 2 pipeline buffers per seg input + accumulator + cls + outs,
    # clamped below the actual chip's VMEM capacity.
    seg_tile_bytes = block_rows * lane_pad * (pseg2.dtype.itemsize
                                              + tseg2.dtype.itemsize)
    cls_bytes = 2 * 2 * _round_up(pcls2.shape[0], 8) * _round_up(pcls2.shape[1], 128) * 4
    need = (2 * seg_tile_bytes + acc_rows * lane_pad * 4 + cls_bytes
            + 2 * 2 * 8 * 128 * 4)
    vmem_limit = int(min(max(need + (8 << 20), 32 << 20),
                         _chip_vmem_bytes() - (4 << 20)))

    n_total = n_seg + n_cls
    cost = pl.CostEstimate(
        flops=6 * n_total,
        transcendentals=2 * n_total,
        bytes_accessed=int(pcls2.size * pcls2.dtype.itemsize
                           + tcls2.size * tcls2.dtype.itemsize
                           + pseg2.size * pseg2.dtype.itemsize
                           + tseg2.size * tseg2.dtype.itemsize
                           + 2 * splits * 8 * 128 * 4))

    seg_out, cls_out = pl.pallas_call(
        kernel,
        out_shape=out_shape,
        grid_spec=pltpu.PrefetchScalarGridSpec(
            num_scalar_prefetch=0,
            grid=(splits, steps),
            in_specs=in_specs,
            out_specs=out_specs,
            scratch_shapes=[pltpu.VMEM((acc_rows, lane), jnp.float32)]),
        compiler_params=pltpu.CompilerParams(
            dimension_semantics=("parallel", "arbitrary"),
            vmem_limit_bytes=vmem_limit),
        cost_estimate=cost,
    )(pcls2, tcls2, pseg2, tseg2)

    # O(1) combine in the wrapper: sum per-split partials, normalize by TRUE
    # element counts, apply seg_weight.
    seg_sum = jnp.sum(seg_out[0::8, 0])
    cls_sum = jnp.sum(cls_out[0::8, 0])
    cls_loss = cls_sum / jnp.float32(n_cls)
    seg_loss = seg_sum / jnp.float32(n_seg)
    return cls_loss + jnp.float32(seg_weight) * seg_loss


def _reference_loss(pcls, tcls, pseg, tseg, seg_weight=0.2):
    # Pure-JAX reference (matches torch BCE-with-logits, mean reduction).
    def bce(x, y):
        x = x.astype(jnp.float32)
        y = y.astype(jnp.float32)
        l = jnp.maximum(x, 0.0) - x * y + jnp.log1p(jnp.exp(-jnp.abs(x)))
        return jnp.mean(l)

    return bce(pcls, tcls) + jnp.float32(seg_weight) * bce(pseg, tseg)


if __name__ == "__main__":
    key = jax.random.PRNGKey(0)
    k1, k2, k3, k4, k5, k6, k7, k8 = jax.random.split(key, 8)

    B, NUM_CLASSES = 2, 4
    pcls = jax.random.normal(k1, (B, NUM_CLASSES), dtype=jnp.float32)
    tcls = jax.random.bernoulli(k2, 0.5, (B, NUM_CLASSES)).astype(jnp.float32)

    # 1) bf16 seg logits, lane-divisible size (single partial block, row mask).
    pseg1 = jax.random.normal(k3, (B, 1, 16, 16), dtype=jnp.float32).astype(jnp.bfloat16)
    tseg1 = jax.random.bernoulli(k4, 0.25, (B, 1, 16, 16)).astype(jnp.float32)
    got1 = jax.block_until_ready(hybrid_cls_seg_loss(pcls, tcls, pseg1, tseg1, 0.2))
    ref1 = _reference_loss(pcls, tcls, pseg1, tseg1, 0.2)
    assert jnp.allclose(got1, ref1, rtol=1e-5, atol=1e-5), (got1, ref1)

    # 2) ragged seg size: divisor lane + boundary-row masking, no jnp.pad copy.
    pseg2 = jax.random.normal(k5, (2, 3, 33, 17), dtype=jnp.float32)
    tseg2 = jax.random.bernoulli(k6, 0.5, (2, 3, 33, 17)).astype(jnp.float32)
    got2 = jax.block_until_ready(hybrid_cls_seg_loss(pcls, tcls, pseg2, tseg2, 0.3))
    ref2 = _reference_loss(pcls, tcls, pseg2, tseg2, 0.3)
    assert jnp.allclose(got2, ref2, rtol=1e-5, atol=1e-5), (got2, ref2)

    # 3) multi-step reduction, exactly divisible rows: pure fast path, no mask.
    pseg3 = jax.random.normal(k7, (2, 8, 32, 32), dtype=jnp.float32).astype(jnp.bfloat16)
    tseg3 = jax.random.bernoulli(k8, 0.4, (2, 8, 32, 32)).astype(jnp.float32)
    got3 = jax.block_until_ready(
        hybrid_cls_seg_loss(pcls, tcls, pseg3, tseg3, 0.2, max_block_rows=8))
    ref3 = _reference_loss(pcls, tcls, pseg3, tseg3, 0.2)
    assert jnp.allclose(got3, ref3, rtol=1e-5, atol=1e-5), (got3, ref3)

    # 4) two splits with a grid-overhang block: exercises the index clamp +
    #    compute gating and per-split combine regardless of TensorCore count.
    pseg4 = jax.random.normal(k3, (2, 12, 32, 32), dtype=jnp.float32)
    tseg4 = jax.random.bernoulli(k4, 0.5, (2, 12, 32, 32)).astype(jnp.float32)
    got4 = jax.block_until_ready(
        hybrid_cls_seg_loss(pcls, tcls, pseg4, tseg4, 0.25,
                            max_block_rows=8, num_splits=2))
    ref4 = _reference_loss(pcls, tcls, pseg4, tseg4, 0.25)
    assert jnp.allclose(got4, ref4, rtol=1e-5, atol=1e-5), (got4, ref4)

    print("KERNEL_OK")
</pallas_src>

<mosaic_0001>
module attributes {stable_mosaic.version = 11 : i64} {
  func.func @_hybrid_loss_kernel(%arg0: i32, %arg1: i32, %arg2: memref<2x4xf32, #tpu.memory_space<vmem>>, %arg3: memref<2x4xf32, #tpu.memory_space<vmem>>, %arg4: memref<8x512xbf16, #tpu.memory_space<vmem>>, %arg5: memref<8x512xf32, #tpu.memory_space<vmem>>, %arg6: memref<8x128xf32, #tpu.memory_space<vmem>>, %arg7: memref<8x128xf32, #tpu.memory_space<vmem>>, %arg8: memref<8x512xf32, #tpu.memory_space<vmem>>) attributes {dimension_semantics = [#tpu.dimension_semantics<parallel>, #tpu.dimension_semantics<arbitrary>], iteration_bounds = array<i64: 1, 1>, scalar_prefetch = 0 : i64, scratch_operands = 1 : i64, tpu.core_type = #tpu.core_type<tc>, window_params = [{pipeline_mode = #tpu.pipeline_mode<synchronous>, transform_indices = @transform_0, window_bounds = array<i64: 2, 4>}, {pipeline_mode = #tpu.pipeline_mode<synchronous>, transform_indices = @transform_1, window_bounds = array<i64: 2, 4>}, {transform_indices = @transform_2, window_bounds = array<i64: 8, 512>}, {transform_indices = @transform_3, window_bounds = array<i64: 8, 512>}, {transform_indices = @transform_4, window_bounds = array<i64: 8, 128>}, {transform_indices = @transform_5, window_bounds = array<i64: 8, 128>}]} {
    %c0_i32 = arith.constant 0 : i32
    %0 = arith.cmpi eq, %arg1, %c0_i32 : i32
    %1 = arith.extui %0 : i1 to i32
    %c0_i32_0 = arith.constant 0 : i32
    %2 = arith.cmpi ne, %1, %c0_i32_0 : i32
    scf.if %2 {
      %cst_9 = arith.constant 0.000000e+00 : f32
      %24 = vector.broadcast %cst_9 : f32 to vector<8x512xf32>
      %c0_10 = arith.constant 0 : index
      %c0_11 = arith.constant 0 : index
      %25 = vector.load %arg8[%c0_10, %c0_11] : memref<8x512xf32, #tpu.memory_space<vmem>>, vector<8x512xf32>
      tpu.vector_store %arg8[%c0_10, %c0_11], %24 {strides = array<i32>} : memref<8x512xf32, #tpu.memory_space<vmem>>, vector<8x512xf32>,
    } else {
    }
    %c0 = arith.constant 0 : index
    %c0_1 = arith.constant 0 : index
    %3 = vector.load %arg4[%c0, %c0_1] : memref<8x512xbf16, #tpu.memory_space<vmem>>, vector<8x512xbf16>
    %c0_2 = arith.constant 0 : index
    %c0_3 = arith.constant 0 : index
    %4 = vector.load %arg5[%c0_2, %c0_3] : memref<8x512xf32, #tpu.memory_space<vmem>>, vector<8x512xf32>
    %5 = arith.extf %3 : vector<8x512xbf16> to vector<8x512xf32>
    %cst = arith.constant 0.000000e+00 : f32
    %6 = vector.broadcast %cst : f32 to vector<8x512xf32>
    %7 = arith.maximumf %5, %6 : vector<8x512xf32>
    %8 = arith.mulf %5, %4 : vector<8x512xf32>
    %9 = arith.subf %7, %8 : vector<8x512xf32>
    %10 = math.absf %5 : vector<8x512xf32>
    %cst_4 = arith.constant 0.000000e+00 : f32
    %11 = vector.broadcast %cst_4 : f32 to vector<8x512xf32>
    %12 = arith.subf %11, %10 : vector<8x512xf32>
    %13 = math.exp %12 : vector<8x512xf32>
    %14 = math.log1p %13 : vector<8x512xf32>
    %15 = arith.addf %9, %14 : vector<8x512xf32>
    %c1_i32 = arith.constant 1 : i32
    %16 = arith.muli %arg0, %c1_i32 : i32
    %17 = arith.addi %16, %arg1 : i32
    %c0_i32_5 = arith.constant 0 : i32
    %18 = arith.cmpi eq, %17, %c0_i32_5 : i32
    %19 = arith.extui %18 : i1 to i32
    %c0_i32_6 = arith.constant 0 : i32
    %20 = arith.cmpi ne, %19, %c0_i32_6 : i32
    scf.if %20 {
      %24 = tpu.iota {dimensions = array<i32: 0>} : vector<8x512xi32>
      %c1_i32_9 = arith.constant 1 : i32
      %25 = vector.broadcast %c1_i32_9 : i32 to vector<8x512xi32>
      %26 = arith.cmpi slt, %24, %25 : vector<8x512xi32>
      %cst_10 = arith.constant 0.000000e+00 : f32
      %27 = vector.broadcast %cst_10 : f32 to vector<8x512xf32>
      %28 = arith.select %26, %15, %27 : vector<8x512xi1>, vector<8x512xf32>
      %c0_11 = arith.constant 0 : index
      %c0_12 = arith.constant 0 : index
      %29 = vector.load %arg8[%c0_11, %c0_12] : memref<8x512xf32, #tpu.memory_space<vmem>>, vector<8x512xf32>
      %30 = arith.addf %29, %28 : vector<8x512xf32>
      %c0_13 = arith.constant 0 : index
      %c0_14 = arith.constant 0 : index
      %31 = vector.load %arg8[%c0_13, %c0_14] : memref<8x512xf32, #tpu.memory_space<vmem>>, vector<8x512xf32>
      tpu.vector_store %arg8[%c0_13, %c0_14], %30 {strides = array<i32>} : memref<8x512xf32, #tpu.memory_space<vmem>>, vector<8x512xf32>,
    } else {
    }
    %c0_i32_7 = arith.constant 0 : i32
    %21 = arith.cmpi eq, %arg1, %c0_i32_7 : i32
    %22 = arith.extui %21 : i1 to i32
    %c0_i32_8 = arith.constant 0 : i32
    %23 = arith.cmpi ne, %22, %c0_i32_8 : i32
    scf.if %23 {
      %c0_9 = arith.constant 0 : index
      %c0_10 = arith.constant 0 : index
      %24 = vector.load %arg8[%c0_9, %c0_10] : memref<8x512xf32, #tpu.memory_space<vmem>>, vector<8x512xf32>
      %25 = vector.shape_cast %24 : vector<8x512xf32> to vector<1x8x512xf32>
      %cst_11 = arith.constant dense<0.000000e+00> : vector<1xf32>
      %26 = vector.multi_reduction <add>, %25, %cst_11 [1, 2] : vector<1x8x512xf32> to vector<1xf32>
      %27 = vector.shape_cast %26 : vector<1xf32> to vector<1x1x1xf32>
      %28 = vector.extract %27[0, 0, 0] : f32 from vector<1x1x1xf32>
      %29 = vector.broadcast %28 : f32 to vector<8x128xf32>
      %c0_12 = arith.constant 0 : index
      %c0_13 = arith.constant 0 : index
      %30 = vector.load %arg6[%c0_12, %c0_13] : memref<8x128xf32, #tpu.memory_space<vmem>>, vector<8x128xf32>
      tpu.vector_store %arg6[%c0_12, %c0_13], %29 {strides = array<i32>} : memref<8x128xf32, #tpu.memory_space<vmem>>, vector<8x128xf32>,
      %c0_i32_14 = arith.constant 0 : i32
      %31 = arith.cmpi eq, %arg0, %c0_i32_14 : i32
      %32 = arith.extui %31 : i1 to i32
      %c0_i32_15 = arith.constant 0 : i32
      %33 = arith.cmpi ne, %32, %c0_i32_15 : i32
      scf.if %33 {
        %c0_18 = arith.constant 0 : index
        %c0_19 = arith.constant 0 : index
        %37 = vector.load %arg2[%c0_18, %c0_19] : memref<2x4xf32, #tpu.memory_space<vmem>>, vector<2x4xf32>
        %c0_20 = arith.constant 0 : index
        %c0_21 = arith.constant 0 : index
        %38 = vector.load %arg3[%c0_20, %c0_21] : memref<2x4xf32, #tpu.memory_space<vmem>>, vector<2x4xf32>
        %cst_22 = arith.constant 0.000000e+00 : f32
        %39 = vector.broadcast %cst_22 : f32 to vector<2x4xf32>
        %40 = arith.maximumf %37, %39 : vector<2x4xf32>
        %41 = arith.mulf %37, %38 : vector<2x4xf32>
        %42 = arith.subf %40, %41 : vector<2x4xf32>
        %43 = math.absf %37 : vector<2x4xf32>
        %cst_23 = arith.constant 0.000000e+00 : f32
        %44 = vector.broadcast %cst_23 : f32 to vector<2x4xf32>
        %45 = arith.subf %44, %43 : vector<2x4xf32>
        %46 = math.exp %45 : vector<2x4xf32>
        %47 = math.log1p %46 : vector<2x4xf32>
        %48 = arith.addf %42, %47 : vector<2x4xf32>
        %49 = vector.shape_cast %48 : vector<2x4xf32> to vector<1x2x4xf32>
        %cst_24 = arith.constant dense<0.000000e+00> : vector<1xf32>
        %50 = vector.multi_reduction <add>, %49, %cst_24 [1, 2] : vector<1x2x4xf32> to vector<1xf32>
        %51 = vector.shape_cast %50 : vector<1xf32> to vector<1x1x1xf32>
        %52 = vector.extract %51[0, 0, 0] : f32 from vector<1x1x1xf32>
        %53 = vector.broadcast %52 : f32 to vector<8x128xf32>
        %c0_25 = arith.constant 0 : index
        %c0_26 = arith.constant 0 : index
        %54 = vector.load %arg7[%c0_25, %c0_26] : memref<8x128xf32, #tpu.memory_space<vmem>>, vector<8x128xf32>
        tpu.vector_store %arg7[%c0_25, %c0_26], %53 {strides = array<i32>} : memref<8x128xf32, #tpu.memory_space<vmem>>, vector<8x128xf32>,
      } else {
      }
      %c0_i32_16 = arith.constant 0 : i32
      %34 = arith.cmpi ne, %arg0, %c0_i32_16 : i32
      %35 = arith.extui %34 : i1 to i32
      %c0_i32_17 = arith.constant 0 : i32
      %36 = arith.cmpi ne, %35, %c0_i32_17 : i32
      scf.if %36 {
        %cst_18 = arith.constant 0.000000e+00 : f32
        %37 = vector.broadcast %cst_18 : f32 to vector<8x128xf32>
        %c0_19 = arith.constant 0 : index
        %c0_20 = arith.constant 0 : index
        %38 = vector.load %arg7[%c0_19, %c0_20] : memref<8x128xf32, #tpu.memory_space<vmem>>, vector<8x128xf32>
        tpu.vector_store %arg7[%c0_19, %c0_20], %37 {strides = array<i32>} : memref<8x128xf32, #tpu.memory_space<vmem>>, vector<8x128xf32>,
      } else {
      }
    } else {
    }
    return
  }
  func.func @transform_0(%arg0: i32, %arg1: i32) -> (i32, i32) {
    %c0_i32 = arith.constant 0 : i32
    %c0_i32_0 = arith.constant 0 : i32
    %c0_i32_1 = arith.constant 0 : i32
    return %c0_i32, %c0_i32_0 : i32, i32
  }
  func.func @transform_1(%arg0: i32, %arg1: i32) -> (i32, i32) {
    %c0_i32 = arith.constant 0 : i32
    %c0_i32_0 = arith.constant 0 : i32
    %c0_i32_1 = arith.constant 0 : i32
    return %c0_i32, %c0_i32_0 : i32, i32
  }
  func.func @transform_2(%arg0: i32, %arg1: i32) -> (i32, i32) {
    %c1_i32 = arith.constant 1 : i32
    %0 = arith.muli %arg0, %c1_i32 : i32
    %1 = arith.addi %0, %arg1 : i32
    %c0_i32 = arith.constant 0 : i32
    %2 = arith.minsi %1, %c0_i32 : i32
    %c0_i32_0 = arith.constant 0 : i32
    %c0_i32_1 = arith.constant 0 : i32
    return %2, %c0_i32_0 : i32, i32
  }
  func.func @transform_3(%arg0: i32, %arg1: i32) -> (i32, i32) {
    %c1_i32 = arith.constant 1 : i32
    %0 = arith.muli %arg0, %c1_i32 : i32
    %1 = arith.addi %0, %arg1 : i32
    %c0_i32 = arith.constant 0 : i32
    %2 = arith.minsi %1, %c0_i32 : i32
    %c0_i32_0 = arith.constant 0 : i32
    %c0_i32_1 = arith.constant 0 : i32
    return %2, %c0_i32_0 : i32, i32
  }
  func.func @transform_4(%arg0: i32, %arg1: i32) -> (i32, i32) {
    %c0_i32 = arith.constant 0 : i32
    %c0_i32_0 = arith.constant 0 : i32
    return %arg0, %c0_i32 : i32, i32
  }
  func.func @transform_5(%arg0: i32, %arg1: i32) -> (i32, i32) {
    %c0_i32 = arith.constant 0 : i32
    %c0_i32_0 = arith.constant 0 : i32
    return %arg0, %c0_i32 : i32, i32
  }
}

</mosaic_0001>

<bundles_post_ra>
// kernel: tpu_custom_call.1
= control target key start
LH: loop header
LB: loop body
LE: loop exit
PB: predicated region body
PF: predicated region fallthrough
CT: control target
= control target key end

     0   :  { %11 = vsyncpa [#allocation4], 0  ;;  %s698_s0 = inlined_call_operand.hbm [shape: f32[2,4], index: 0, kind: input, shape index: {}]   ;;  %s699_s1 = inlined_call_operand.hbm [shape: f32[2,4], index: 1, kind: input, shape index: {}]   ;;  %s700_s2 = inlined_call_operand.hbm [shape: bf16[1,512], index: 2, kind: input, shape index: {}]   ;;  %s701_s3 = inlined_call_operand.vmem [shape: f32[1,512], index: 3, kind: input, shape index: {}]   ;;  %s702_s4 = inlined_call_operand.hbm [shape: f32[8,128], index: 4, kind: output, shape index: {0}]   ;;  %s703_s5 = inlined_call_operand.hbm [shape: f32[8,128], index: 5, kind: output, shape index: {1}]  }
   0x1   :  { %12 = vsyncpa [#allocation7], 0 }
   0x2   :  { %13 = vsyncpa [#allocation5], 0 }
   0x3   :  { %14 = vsyncpa [#allocation11], 0  ;;  %s586_s18 = smov [#allocation3]   ;;  %s587_s20 = smov [#allocation6]  }
   0x4   :  { %s21_s19 = sshll.u32 %s586_s18, 4  ;;  %s31_s21 = sshll.u32 %s587_s20, 4  ;;  %s22_s19 = int_to_ptr.vmem [resolvable:$true] %s21_s19  ;;  %s32_s21 = int_to_ptr.vmem [resolvable:$true] %s31_s21 }
   0x5   :  { %s486_s22 = scalar_lea.vmem %s22_s19, 32  ;;  %p491_p1 = scmp.lt.s32.totalorder %s22_s19, %s22_s19 }
   0x6   :  { %p487_p0 = scmp.ne.s32.totalorder %s22_s19, %s486_s22  ;;  %p492_p2 = scmp.lt.s32.totalorder %s486_s22, %s486_s22 }
   0x8   :  { %p493_p3 = por %p492_p2, %p491_p1 }
   0xa   :  { %p494_p4 = pnand %p493_p3, %p487_p0 }
   0xc   :  { %497 = shalt.err (!%p494_p4)
}
   0xd   :  { %24 = dma.hbm_to_vmem [thread:$0]  %s698_s0, 32, %s22_s19, [#allocation4]  }
   0xe   :  { %s506_s25 = scalar_lea.vmem %s32_s21, 32  ;;  %p511_p6 = scmp.lt.s32.totalorder %s32_s21, %s32_s21 }
   0xf   :  { %p507_p5 = scmp.ne.s32.totalorder %s32_s21, %s506_s25  ;;  %p512_p7 = scmp.lt.s32.totalorder %s506_s25, %s506_s25 }
  0x11   :  { %p513_p8 = por %p512_p7, %p511_p6 }
  0x13   :  { %p514_p9 = pnand %p513_p8, %p507_p5 }
  0x15   :  { %517 = shalt.err (!%p514_p9)
}
  0x16   :  { %34 = dma.hbm_to_vmem [thread:$0]  %s699_s1, 32, %s32_s21, [#allocation7]  }
  0x17   :  { %46 = vsyncadd [#allocation7], 192  ;;  %s588_s28 = smov [#allocation8]  }
  0x18   :  { %s52_s29 = sshll.u32 %s588_s28, 4  ;;  %s53_s29 = int_to_ptr.vmem [resolvable:$true] %s52_s29 }
  0x19   :  { %s526_s30 = scalar_lea.vmem %s53_s29, 64  ;;  %s530_s6 = scalar_lea.vmem %s53_s29, 256 }
  0x1a   :  { %p527_p10 = scmp.ne.s32.totalorder %s53_s29, %s526_s30  ;;  %p531_p11 = scmp.lt.s32.totalorder %s53_s29, %s53_s29 }
  0x1b   :  { %p532_p12 = scmp.lt.s32.totalorder %s530_s6, %s526_s30 }
  0x1d   :  { %p533_p13 = por %p532_p12, %p531_p11 }
  0x1f   :  { %p534_p0 = pnand %p533_p13, %p527_p10 }
  0x21   :  { %537 = shalt.err (!%p534_p0)
}
  0x22   :  { %s589_s0 = smov 64   ;;  %s590_s7 = smov 4  }
  0x23   :  { %58 = dma.hbm_to_vmem [thread:$0]  %s700_s2, 64, %s53_s29, [#allocation7], %s589_s0, %s589_s0, %s590_s7  }
  0x24   :  { %578 = dma.done.wait [#allocation4], 32  }
  0x25   :  { %579 = vsyncadd [#allocation4], 4294967264 }
  0x26   :  { %580 = dma.done.wait [#allocation7], 288  }
  0x27   :  { %581 = vsyncadd [#allocation7], 4294967008  ;;  %v429_v0 = vld [vmem:[#allocation8] sm:$0xff]   ;;  %v436_v1 = vld [vmem:[#allocation8 + $0x8] sm:$0xff]   ;;  %v164_v22 = vlaneseq  ;;  %v591_v54 = vmov 1983009808  }
  0x28   :  { %v633_v2 = vunpack.c.l.bf16 %v429_v0  ;;  %v635_v3 = vunpack.c.h.bf16 %v429_v0  ;;  %v637_v4 = vunpack.c.l.bf16 %v436_v1  ;;  %v639_v5 = vunpack.c.h.bf16 %v436_v1  ;;  %v645_v14 = vld [vmem:[#allocation3] sm:$0x3]  ;;  %v474_v31 = vld.sshfl [vmem:[%s701_s3] sm:$0xff pattern:$0x73625140]  ;;  %s593_s18 = smov [#allocation10]  }
  0x29   :  { %v358_v19 = vand.u32 2147483647, %v645_v14  ;;  %v648_v24 = vshrl.u32 %v164_v22, 7  ;;  %v475_v32 = vld.sshfl [vmem:[%s701_s3 + $0x8] sm:$0xff pattern:$0x73625140]  ;;  %v277_v55 = vunpack.c.l.s4 %v591_v54 }
  0x2a   :  { %v204_v6 = vand.u32 2147483647, %v633_v2  ;;  %v205_v7 = vand.u32 2147483647, %v635_v3  ;;  %v206_v8 = vand.u32 2147483647, %v637_v4  ;;  %v196_v45 = vmul.f32 %v474_v31, %v633_v2 }
  0x2b   :  { %v207_v9 = vand.u32 2147483647, %v639_v5  ;;  %v359_v20 = vsub.f32 0.0, %v358_v19  ;;  %v476_v34 = vld.sshfl [vmem:[%s701_s3 + $0x10] sm:$0xff pattern:$0x73625140]  ;;  %v197_v48 = vmul.f32 %v475_v32, %v635_v3 }
  0x2c   :  { %v208_v10 = vsub.f32 0.0, %v204_v6  ;;  %v209_v11 = vsub.f32 0.0, %v205_v7  ;;  %v210_v12 = vsub.f32 0.0, %v206_v8  ;;  %v477_v36 = vld.sshfl [vmem:[%s701_s3 + $0x18] sm:$0xff pattern:$0x73625140]  ;;  %v198_v52 = vmul.f32 %v476_v34, %v637_v4 }
  0x2d   :  { %v211_v13 = vsub.f32 0.0, %v207_v9  ;;  %v360_v21 = vmul.f32 1.442695, %v359_v20  ;;  %v148_v41 = vmax.f32 %v633_v2, 0.0  ;;  %v149_v44 = vmax.f32 %v635_v3, 0.0  ;;  %s592_s3 = smov [#allocation9]  }
  0x2e   :  { %v212_v15 = vmul.f32 1.442695, %v208_v10  ;;  %v214_v16 = vmul.f32 1.442695, %v209_v11  ;;  %v216_v17 = vmul.f32 1.442695, %v210_v12  ;;  %v199_v57 = vmul.f32 %v477_v36, %v639_v5 }
  0x2f   :  { %v218_v18 = vmul.f32 1.442695, %v211_v13  ;;  %v150_v51 = vmax.f32 %v637_v4, 0.0  ;;  %v151_v56 = vmax.f32 %v639_v5, 0.0  ;;  %v200_v61 = vsub.f32 %v148_v41, %v196_v45  ;;  %s396_s16 = sshll.u32 %s592_s3, 4  ;;  %s406_s19 = sshll.u32 %s593_s18, 4  ;;  %s397_s16 = int_to_ptr.vmem [resolvable:$true] %s396_s16  ;;  %s407_s19 = int_to_ptr.vmem [resolvable:$true] %s406_s19 }
  0x30   :  { %454 = vpow2.f32 %v212_v15  ;;  %v201_v2 = vsub.f32 %v149_v44, %v197_v48  ;;  %v278_v9 = vunpack.c.0.s8 %v277_v55  ;;  %vm267_vm4 = vcmp.lt.s32.totalorder %v648_v24, 1  ;;  %s538_s20 = scalar_lea.vmem %s397_s16, 128  ;;  %p543_p2 = scmp.lt.s32.totalorder %s397_s16, %s397_s16 }
  0x31   :  { %456 = vpow2.f32 %v214_v16  ;;  %v202_v5 = vsub.f32 %v150_v51, %v198_v52  ;;  %v203_v15 = vsub.f32 %v151_v56, %v199_v57  ;;  %vm372_vm6 = vcmask 25600   ;;  %p539_p1 = scmp.ne.s32.totalorder %s397_s16, %s538_s20  ;;  %p544_p3 = scmp.lt.s32.totalorder %s538_s20, %s538_s20 }
  0x32   :  { %458 = vpow2.f32 %v216_v17 }
  0x33   :  { %460 = vpow2.f32 %v218_v18  ;;  %p545_p4 = por %p544_p3, %p543_p2 }
  0x34   :  { %462 = vpow2.f32 %v360_v21 }
  0x35   :  { %p546_p5 = pnand %p545_p4, %p539_p1 }
  0x3d   :  { %v455_v23 = vpop.eup %454 }
  0x3e   :  { %v457_v25 = vpop.eup %456  ;;  %v220_v26 = vadd.f32 1.0, %v455_v23  ;;  %v223_v37 = vmul.f32 -0.5, %v455_v23  ;;  %v226_v46 = vand.u32 2147483647, %v455_v23 }
  0x3f   :  { %v459_v27 = vpop.eup %458  ;;  %v229_v28 = vadd.f32 1.0, %v457_v25  ;;  %v232_v38 = vmul.f32 -0.5, %v457_v25  ;;  %v235_v49 = vand.u32 2147483647, %v457_v25 }
  0x40   :  { %v461_v29 = vpop.eup %460  ;;  %464 = vlog2.f32 %v220_v26  ;;  %v238_v30 = vadd.f32 1.0, %v459_v27  ;;  %v241_v39 = vmul.f32 -0.5, %v459_v27  ;;  %v224_v42 = vadd.f32 1.0, %v223_v37 }
  0x41   :  { %466 = vlog2.f32 %v229_v28  ;;  %v247_v33 = vadd.f32 1.0, %v461_v29  ;;  %v659_v35 = vpop.eup %462  ;;  %v250_v43 = vmul.f32 -0.5, %v461_v29  ;;  %v233_v47 = vadd.f32 1.0, %v232_v38 }
  0x42   :  { %468 = vlog2.f32 %v238_v30  ;;  %v362_v40 = vadd.f32 1.0, %v659_v35  ;;  %v242_v50 = vadd.f32 1.0, %v241_v39  ;;  %v244_v53 = vand.u32 2147483647, %v459_v27 }
  0x43   :  { %470 = vlog2.f32 %v247_v33  ;;  %v225_v58 = vmul.f32 %v455_v23, %v224_v42  ;;  %v251_v59 = vadd.f32 1.0, %v250_v43  ;;  %vm673_vm0 = vcmp.lt.f32.partialorder %v226_v46, 0.0004427343 }
  0x44   :  { %472 = vlog2.f32 %v362_v40  ;;  %v234_v63 = vmul.f32 %v457_v25, %v233_v47  ;;  %v253_v0 = vand.u32 2147483647, %v461_v29  ;;  %vm677_vm1 = vcmp.lt.f32.partialorder %v235_v49, 0.0004427343 }
  0x45   :  { %v243_v6 = vmul.f32 %v459_v27, %v242_v50  ;;  %vm245_vm2 = vcmp.lt.f32.partialorder %v244_v53, 0.0004427343  ;;  %v252_v12 = vmul.f32 %v461_v29, %v251_v59  ;;  %v365_v21 = vmul.f32 -0.5, %v659_v35  ;;  %v354_v29 = vld [vmem:[#allocation6] sm:$0x3] }
  0x46   :  { %vm254_vm3 = vcmp.lt.f32.partialorder %v253_v0, 0.0004427343  ;;  %v281_v23 = vsub.s32 %v278_v9, %v648_v24  ;;  %v368_v31 = vand.u32 2147483647, %v659_v35  ;;  %v355_v40 = vmax.f32 %v645_v14, 0.0 }
  0x47   :  { %v366_v30 = vadd.f32 1.0, %v365_v21  ;;  %v356_v41 = vmul.f32 %v354_v29, %v645_v14 }
  0x48   :  { %vm369_vm5 = vcmp.lt.f32.partialorder %v368_v31, 0.0004427343 }
  0x49   :  { %v367_v43 = vmul.f32 %v659_v35, %v366_v30  ;;  %v357_v51 = vsub.f32 %v355_v40, %v356_v41 }
  0x4d   :  { %v465_v60 = vpop.eup %464 }
  0x4e   :  { %v467_v1 = vpop.eup %466  ;;  %v222_v3 = vmul.f32 0.6931472, %v465_v60 }
  0x4f   :  { %v469_v7 = vpop.eup %468  ;;  %v231_v8 = vmul.f32 0.6931472, %v467_v1 }
  0x50   :  { %v228_v10 = vsel %vm673_vm0, %v225_v58, %v222_v3  ;;  %v240_v11 = vmul.f32 0.6931472, %v469_v7  ;;  %v471_v13 = vpop.eup %470 }
  0x51   :  { %v237_v16 = vsel %vm677_vm1, %v234_v63, %v231_v8  ;;  %v256_v17 = vadd.f32 %v228_v10, %v200_v61  ;;  %v249_v19 = vmul.f32 0.6931472, %v471_v13  ;;  %v473_v32 = vpop.eup %472 }
  0x52   :  { %v246_v18 = vsel %vm245_vm2, %v243_v6, %v240_v11  ;;  %v257_v20 = vadd.f32 %v237_v16, %v201_v2  ;;  %v364_v42 = vmul.f32 0.6931472, %v473_v32 }
  0x53   :  { %v258_v22 = vadd.f32 %v246_v18, %v202_v5  ;;  %v255_v25 = vsel %vm254_vm3, %v252_v12, %v249_v19 }
  0x54   :  { %v272_v26 = vcombine.low %v256_v17, %v257_v20  ;;  %v273_v27 = vcombine.high %v256_v17, %v257_v20  ;;  %v259_v28 = vadd.f32 %v255_v25, %v203_v15  ;;  %v370_v53 = vsel %vm369_vm5, %v367_v43, %v364_v42 }
  0x55   :  { %v371_v56 = vadd.f32 %v370_v53, %v357_v51 }
  0x56   :  { %v274_v33 = vcombine.low %v258_v22, %v259_v28  ;;  %v275_v34 = vcombine.high %v258_v22, %v259_v28  ;;  %v282_v36 = vrot.slane %v272_v26, %v281_v23  ;;  %v289_v37 = vrot.slane %v273_v27, %v281_v23 }
  0x57   :  { %v373_v24 = vsel %vm372_vm6, %v371_v56, 0.0 }
  0x58   :  { %v296_v38 = vrot.slane %v274_v33, %v281_v23  ;;  %v303_v39 = vrot.slane %v275_v34, %v281_v23 }
  0x5a   :  { %v304_v44 = vcombine.low %v282_v36, %v296_v38  ;;  %v305_v45 = vcombine.high %v282_v36, %v296_v38  ;;  %v306_v46 = vcombine.low %v289_v37, %v303_v39  ;;  %v307_v47 = vcombine.high %v289_v37, %v303_v39 }
  0x5c   :  { %v312_v48 = vsel %vm267_vm4, %v304_v44, 0.0  ;;  %v313_v49 = vsel %vm267_vm4, %v305_v45, 0.0  ;;  %v314_v50 = vsel %vm267_vm4, %v306_v46, 0.0  ;;  %v315_v54 = vsel %vm267_vm4, %v307_v47, 0.0 }
  0x5d   :  { %v335_v52 = vadd.f32 %v313_v49, %v312_v48 }
  0x5f   :  { %v336_v55 = vadd.f32 %v335_v52, %v314_v50 }
  0x61   :  { %v337_v14 = vadd.f32 %v336_v55, %v315_v54 }
  0x63   :  { %338 = vadd.xlane.f32.xlu0 %v337_v14 }
  0x67   :  { %374 = vadd.xlane.f32.xlu0 %v373_v24 }
  0xec   :  { %v339_v35 = vpop.xlane.xlu0 %338 }
  0xed   :  { %v340_v57 = vrot.slane %v339_v35, 4 }
  0xef   :  { %v341_v58 = vadd.f32 %v340_v57, %v339_v35 }
  0xf0   :  { %v375_v59 = vpop.xlane.xlu0 %374 }
  0xf1   :  { %v342_v60 = vrot.slane %v341_v58, 2  ;;  %v376_v61 = vrot.slane %v375_v59, 4 }
  0xf3   :  { %v377_v62 = vadd.f32 %v376_v61, %v375_v59  ;;  %v343_v63 = vadd.f32 %v342_v60, %v341_v58 }
  0xf5   :  { %v378_v0 = vrot.slane %v377_v62, 2  ;;  %v344_v1 = vrot.slane %v343_v63, 1 }
  0xf7   :  { %v379_v2 = vadd.f32 %v378_v0, %v377_v62  ;;  %v345_v3 = vadd.f32 %v344_v1, %v343_v63 }
  0xf9   :  { %437 = vpush %v345_v3  ;;  %v380_v4 = vrot.slane %v379_v2, 1 }
  0xfb   :  { %v381_v6 = vadd.f32 %v380_v4, %v379_v2 }
  0xfd   :  { %439 = vpush %v381_v6 }
 0x12a   :  { %s438_s17 = spop %437 }
 0x12b   :  { %v347_v7 = vstv %s438_s17 }
 0x12c   :  { %348 = vst [vmem:[#allocation9] sm:$0xff] %v347_v7 }
 0x12d   :  { %549 = shalt.err (!%p546_p5)
}
 0x12e   :  { %399 = dma.vmem_to_hbm [thread:$0]  %s397_s16, 128, %s702_s4, [#allocation5]  }
 0x12f   :  { %s440_s23 = spop %439  ;;  %s558_s24 = scalar_lea.vmem %s407_s19, 128 }
 0x130   :  { %v383_v5 = vstv %s440_s23  ;;  %p559_p6 = scmp.ne.s32.totalorder %s407_s19, %s558_s24  ;;  %p563_p7 = scmp.lt.s32.totalorder %s407_s19, %s407_s19 }
 0x131   :  { %384 = vst [vmem:[#allocation10] sm:$0xff] %v383_v5  ;;  %p564_p8 = scmp.lt.s32.totalorder %s558_s24, %s558_s24 }
 0x133   :  { %p565_p9 = por %p564_p8, %p563_p7 }
 0x135   :  { %p566_p10 = pnand %p565_p9, %p559_p6 }
 0x137   :  { %569 = shalt.err (!%p566_p10)
}
 0x138   :  { %409 = dma.vmem_to_hbm [thread:$0]  %s407_s19, 128, %s703_s5, [#allocation11]  }
 0x139   :  { %582 = dma.done.wait [#allocation5], 128  }
 0x13a   :  { %583 = vsyncadd [#allocation5], 4294967168 }
 0x13b   :  { %584 = dma.done.wait [#allocation11], 128  }
 0x13c   :  { %585 = vsyncadd [#allocation11], 4294967168 }
 0x13d   :  { %416 = vsyncpa [#allocation4], 1 }
 0x13e   :  { %417 = vsyncpa [#allocation7], 1 }
 0x13f   :  { %418 = vsyncpa [#allocation5], 1 }
 0x140   :  { %419 = vsyncpa [#allocation11], 1 }

</bundles_post_ra>
